<compile_context>
chip_gen: v5e
topology: v5e:2x2
jax: 0.10.0
libtpu: 0.0.40
codegen_flags: <defaults>
</compile_context>

<pallas_src>
import jax
import jax.numpy as jnp
from jax.experimental import pallas as pl
from jax.experimental.pallas import tpu as pltpu


def _round_up(a: int, b: int) -> int:
    return (a + b - 1) // b * b


def smn_kernel(src_ref, dst_ref, dst_row_ref, xw_ref, out_ref):
    # src_ref     : [TE, 1]           int32  (edge block, sentinel-padded)
    # dst_ref     : [TE, 1]           int32
    # dst_row_ref : [1, TE]           int32  (lane-dense copy of dst for the scatter)
    # xw_ref      : [2*N_pad, H_blk]  edge_dtype  ([X@W1^T ; X@W2^T], zero-padded)
    # out_ref     : [N_pad, H_blk]    f32    (accumulator across edge blocks)
    te = src_ref.shape[0]
    n_pad = out_ref.shape[0]
    edge_dtype = xw_ref.dtype

    @pl.when(pl.program_id(1) == 0)
    def _():
        out_ref[...] = jnp.zeros_like(out_ref)

    # Fused gather one-hot [TE, 2*N_pad]: row e has ones at columns src[e] and
    # N_pad + dst[e].  Sentinel-padded edges (index 2*N_pad) match nothing.
    col_ids = jax.lax.broadcasted_iota(jnp.int32, (te, 2 * n_pad), 1)
    g_gather = ((col_ids == src_ref[...]) |
                (col_ids == dst_ref[...] + n_pad)).astype(edge_dtype)

    # msg = concat(x[src], x[dst]) @ W.T  ==  g_gather @ [X@W1^T ; X@W2^T]
    msg = jnp.dot(g_gather, xw_ref[...],
                  preferred_element_type=jnp.float32)            # [TE, H_blk]

    # Scatter one-hot built directly in the transposed orientation [N_pad, TE]
    # (no cross-lane transpose needed for the scatter matmul).
    row_ids = jax.lax.broadcasted_iota(jnp.int32, (n_pad, te), 0)
    s_dst_t = (row_ids == dst_row_ref[...]).astype(edge_dtype)   # [N_pad, TE]

    # scatter_sum over dst: plain matmul contracting the edge axis.
    out_ref[...] += jnp.dot(s_dst_t, msg.astype(edge_dtype),
                            preferred_element_type=jnp.float32)


def _vmem_budget_bytes() -> int:
    try:
        cap = pltpu.get_tpu_info().vmem_capacity_bytes
    except Exception:
        cap = 64 * 1024 * 1024        # conservative (v7x-sized) fallback
    return int(cap * 0.85)


def _vmem_estimate(te: int, n_pad: int, h_blk: int, edge_bytes: int) -> int:
    # Rough per-step VMEM footprint (double-buffered inputs + temporaries).
    idx_tiles = 2 * 2 * te * 128 * 4          # src/dst [TE,1] padded to 128 lanes
    idx_row = 2 * 8 * te * 4                  # dst_row [1,TE] padded to 8 sublanes
    xw = 2 * 2 * n_pad * h_blk * edge_bytes   # resident stacked xw
    out = 2 * n_pad * h_blk * 4               # resident f32 accumulator
    onehots = te * 2 * n_pad * edge_bytes + n_pad * te * edge_bytes
    msg = te * h_blk * (4 + edge_bytes)
    contrib = n_pad * h_blk * 4
    return idx_tiles + idx_row + xw + out + onehots + msg + contrib


def symmetric_message_network(edge_idx, x, weight, *,
                              edge_block=None, h_block=None,
                              edge_dtype=jnp.bfloat16):
    """
    edge_idx   : [2, E] int32    edges for this relation (pre-symmetrization)
    x          : [N, H] float32  node states
    weight     : [H, 2H] float32 Linear(2H -> H, bias=False) weight (PyTorch layout)
    edge_block : edge tile size (multiple of 128); None -> device-aware default
    h_block    : hidden column tile (multiple of 128) for a leading "parallel"
                 grid axis; set to 128/256 on v7x (2 TensorCores) when H >= 256.
                 None -> single H block (best for v5e/v6e).
    edge_dtype : dtype of the one-hot / xw matmul operands (bf16 default;
                 jnp.float32 for an exact-up-to-summation-order path)
    returns    : [N, H] float32
    """
    n, h = x.shape
    assert weight.shape == (h, 2 * h)

    # Symmetrize the edge list (matches torch.cat in the reference forward).
    edge_sym = jnp.concatenate(
        [edge_idx, jnp.stack([edge_idx[1], edge_idx[0]], axis=0)], axis=1)   # [2, 2E]
    e2 = edge_sym.shape[1]

    edge_bytes = jnp.dtype(edge_dtype).itemsize
    vmem_budget = _vmem_budget_bytes()

    # Hardware-tile padding.
    h_pad = _round_up(h, 128)                       # lane-dense output columns
    n_pad = _round_up(n, 128)                       # one-hot lane axis

    if h_block is None:
        h_blk = h_pad                               # single H block (v5e/v6e default)
    else:
        h_blk = max(128, _round_up(h_block, 128))
        while h_pad % h_blk != 0:
            h_blk -= 128

    if edge_block is None:
        edge_block = 1024 if vmem_budget >= 80 * 1024 * 1024 else 512
    edge_block = max(128, _round_up(edge_block, 128))

    te = _round_up(min(edge_block, e2), 8)
    if te % 128 == 0:                               # multi-block path: fit VMEM budget
        while te > 128 and _vmem_estimate(te, n_pad, h_blk, edge_bytes) > vmem_budget:
            te //= 2
    e2_pad = _round_up(e2, te)

    # Sentinel index for padded edges: matches neither the gather columns
    # ([0, 2*N_pad)) nor the scatter rows ([0, N_pad)).
    sentinel = 2 * n_pad
    src_col = jnp.full((e2_pad, 1), sentinel, jnp.int32).at[:e2, 0].set(
        edge_sym[0].astype(jnp.int32))
    dst_col = jnp.full((e2_pad, 1), sentinel, jnp.int32).at[:e2, 0].set(
        edge_sym[1].astype(jnp.int32))
    dst_row = dst_col.reshape(1, e2_pad)            # lane-dense copy for the scatter

    # Apply the weights once over the node dimension, outside the kernel.
    x32 = x.astype(jnp.float32)
    w = weight.astype(jnp.float32)
    xw1 = jnp.dot(x32, w[:, :h].T, precision=jax.lax.Precision.HIGHEST)   # [N, H]
    xw2 = jnp.dot(x32, w[:, h:].T, precision=jax.lax.Precision.HIGHEST)   # [N, H]
    xw = jnp.zeros((2 * n_pad, h_pad), edge_dtype)
    xw = xw.at[:n, :h].set(xw1.astype(edge_dtype))
    xw = xw.at[n_pad:n_pad + n, :h].set(xw2.astype(edge_dtype))           # [2*N_pad, H_pad]

    grid = (h_pad // h_blk, e2_pad // te)           # (H columns: parallel, edges: reduce)

    flops = int(6 * e2_pad * n_pad * h_pad)         # gather (2x K) + scatter matmuls
    bytes_accessed = int(4 * 3 * e2_pad
                         + 2 * n_pad * h_pad * edge_bytes * grid[0]
                         + n_pad * h_pad * 4)

    out = pl.pallas_call(
        smn_kernel,
        out_shape=jax.ShapeDtypeStruct((n_pad, h_pad), jnp.float32),
        grid_spec=pltpu.PrefetchScalarGridSpec(
            num_scalar_prefetch=0,
            grid=grid,
            in_specs=[
                pl.BlockSpec((te, 1), lambda j, i: (i, 0)),              # src (sublane)
                pl.BlockSpec((te, 1), lambda j, i: (i, 0)),              # dst (sublane)
                pl.BlockSpec((1, te), lambda j, i: (0, i)),              # dst (lane-dense)
                pl.BlockSpec((2 * n_pad, h_blk), lambda j, i: (0, j)),   # stacked xw
            ],
            out_specs=pl.BlockSpec((n_pad, h_blk), lambda j, i: (0, j)), # accumulator
        ),
        compiler_params=pltpu.CompilerParams(
            dimension_semantics=("parallel", "arbitrary"),
            vmem_limit_bytes=vmem_budget,
        ),
        cost_estimate=pl.CostEstimate(flops=flops, transcendentals=0,
                                      bytes_accessed=bytes_accessed),
    )(src_col, dst_col, dst_row, xw)

    return out[:n, :h]


def reference(edge_idx, x, weight):
    edge_sym = jnp.concatenate(
        [edge_idx, jnp.stack([edge_idx[1], edge_idx[0]], axis=0)], axis=1)
    cat = jnp.concatenate([x[edge_sym[0]], x[edge_sym[1]]], axis=1)   # [2E, 2H]
    msg = jnp.dot(cat, weight.T, precision=jax.lax.Precision.HIGHEST)  # [2E, H]
    return jax.ops.segment_sum(msg, edge_sym[1], num_segments=x.shape[0])


if __name__ == "__main__":
    key = jax.random.PRNGKey(0)
    k_w, k_x, k_e = jax.random.split(key, 3)

    num_vars = 16      # N
    hidden_dim = 32    # H
    num_edges = 8      # E (before symmetrization)

    # Deterministic parameter init (PyTorch Linear-style uniform bound 1/sqrt(fan_in)).
    bound = 1.0 / jnp.sqrt(2.0 * hidden_dim)
    weight = jax.random.uniform(k_w, (hidden_dim, 2 * hidden_dim),
                                minval=-bound, maxval=bound, dtype=jnp.float32)
    x = jax.random.normal(k_x, (num_vars, hidden_dim), dtype=jnp.float32)
    edge_idx = jax.random.randint(k_e, (2, num_edges), 0, num_vars, dtype=jnp.int32)

    r_ref = reference(edge_idx, x, weight)

    # Exact-up-to-summation-order f32 path.
    r_f32 = jax.block_until_ready(
        symmetric_message_network(edge_idx, x, weight, edge_dtype=jnp.float32))
    assert r_f32.shape == (num_vars, hidden_dim)
    assert jnp.allclose(r_f32, r_ref, atol=1e-4, rtol=1e-4), "f32 path mismatch"

    # Default fast path: bf16 operands (one-hots exact in bf16; xw and msg are
    # rounded to bf16, so ~1e-2-level relative error is expected).
    r_bf16 = jax.block_until_ready(symmetric_message_network(edge_idx, x, weight))
    assert r_bf16.shape == (num_vars, hidden_dim)
    assert jnp.allclose(r_bf16, r_ref, atol=5e-2, rtol=5e-2), "bf16 path mismatch"

    print("KERNEL_OK")
</pallas_src>

<mosaic_0001>
module attributes {stable_mosaic.version = 11 : i64} {
  func.func @smn_kernel(%arg0: i32, %arg1: i32, %arg2: memref<16x1xi32, #tpu.memory_space<vmem>>, %arg3: memref<16x1xi32, #tpu.memory_space<vmem>>, %arg4: memref<1x16xi32, #tpu.memory_space<vmem>>, %arg5: memref<256x128xf32, #tpu.memory_space<vmem>>, %arg6: memref<128x128xf32, #tpu.memory_space<vmem>>) attributes {dimension_semantics = [#tpu.dimension_semantics<parallel>, #tpu.dimension_semantics<arbitrary>], iteration_bounds = array<i64: 1, 1>, scalar_prefetch = 0 : i64, scratch_operands = 0 : i64, tpu.core_type = #tpu.core_type<tc>, window_params = [{transform_indices = @transform_0, window_bounds = array<i64: 16, 1>}, {transform_indices = @transform_1, window_bounds = array<i64: 16, 1>}, {transform_indices = @transform_2, window_bounds = array<i64: 1, 16>}, {transform_indices = @transform_3, window_bounds = array<i64: 256, 128>}, {transform_indices = @transform_4, window_bounds = array<i64: 128, 128>}]} {
    %c0_i32 = arith.constant 0 : i32
    %0 = arith.cmpi eq, %arg1, %c0_i32 : i32
    %1 = arith.extui %0 : i1 to i32
    %c0_i32_0 = arith.constant 0 : i32
    %2 = arith.cmpi ne, %1, %c0_i32_0 : i32
    scf.if %2 {
      %cst_13 = arith.constant 0.000000e+00 : f32
      %27 = vector.broadcast %cst_13 : f32 to vector<128x128xf32>
      %c0_14 = arith.constant 0 : index
      %c0_15 = arith.constant 0 : index
      %28 = vector.load %arg6[%c0_14, %c0_15] : memref<128x128xf32, #tpu.memory_space<vmem>>, vector<128x128xf32>
      tpu.vector_store %arg6[%c0_14, %c0_15], %27 {strides = array<i32>} : memref<128x128xf32, #tpu.memory_space<vmem>>, vector<128x128xf32>,
    } else {
    }
    %3 = tpu.iota {dimensions = array<i32: 1>} : vector<16x256xi32>
    %c0 = arith.constant 0 : index
    %c0_1 = arith.constant 0 : index
    %4 = vector.load %arg2[%c0, %c0_1] : memref<16x1xi32, #tpu.memory_space<vmem>>, vector<16x1xi32>
    %5 = vector.broadcast %4 : vector<16x1xi32> to vector<16x256xi32>
    %6 = arith.cmpi eq, %3, %5 : vector<16x256xi32>
    %c0_2 = arith.constant 0 : index
    %c0_3 = arith.constant 0 : index
    %7 = vector.load %arg3[%c0_2, %c0_3] : memref<16x1xi32, #tpu.memory_space<vmem>>, vector<16x1xi32>
    %c128_i32 = arith.constant 128 : i32
    %8 = vector.broadcast %c128_i32 : i32 to vector<16x1xi32>
    %9 = arith.addi %7, %8 : vector<16x1xi32>
    %10 = vector.broadcast %9 : vector<16x1xi32> to vector<16x256xi32>
    %11 = arith.cmpi eq, %3, %10 : vector<16x256xi32>
    %12 = arith.ori %6, %11 : vector<16x256xi1>
    %13 = arith.extui %12 : vector<16x256xi1> to vector<16x256xi32>
    %14 = arith.sitofp %13 : vector<16x256xi32> to vector<16x256xf32>
    %c0_4 = arith.constant 0 : index
    %c0_5 = arith.constant 0 : index
    %15 = vector.load %arg5[%c0_4, %c0_5] : memref<256x128xf32, #tpu.memory_space<vmem>>, vector<256x128xf32>
    %cst = arith.constant dense<0.000000e+00> : vector<16x128xf32>
    %16 = tpu.matmul %14, %15, %cst {dimension_numbers = #tpu.dot_dimension_numbers<[1], [0], [0], [1], [0, 0, 1, 1], [], []>} : vector<16x256xf32>, vector<256x128xf32>, vector<16x128xf32> -> vector<16x128xf32>
    %17 = tpu.iota {dimensions = array<i32: 0>} : vector<128x16xi32>
    %c0_6 = arith.constant 0 : index
    %c0_7 = arith.constant 0 : index
    %18 = vector.load %arg4[%c0_6, %c0_7] : memref<1x16xi32, #tpu.memory_space<vmem>>, vector<1x16xi32>
    %19 = vector.broadcast %18 : vector<1x16xi32> to vector<128x16xi32>
    %20 = arith.cmpi eq, %17, %19 : vector<128x16xi32>
    %21 = arith.extui %20 : vector<128x16xi1> to vector<128x16xi32>
    %22 = arith.sitofp %21 : vector<128x16xi32> to vector<128x16xf32>
    %c0_8 = arith.constant 0 : index
    %c0_9 = arith.constant 0 : index
    %23 = vector.load %arg6[%c0_8, %c0_9] : memref<128x128xf32, #tpu.memory_space<vmem>>, vector<128x128xf32>
    %cst_10 = arith.constant dense<0.000000e+00> : vector<128x128xf32>
    %24 = tpu.matmul %22, %16, %cst_10 {dimension_numbers = #tpu.dot_dimension_numbers<[1], [0], [0], [1], [0, 0, 1, 1], [], []>} : vector<128x16xf32>, vector<16x128xf32>, vector<128x128xf32> -> vector<128x128xf32>
    %25 = arith.addf %23, %24 : vector<128x128xf32>
    %c0_11 = arith.constant 0 : index
    %c0_12 = arith.constant 0 : index
    %26 = vector.load %arg6[%c0_11, %c0_12] : memref<128x128xf32, #tpu.memory_space<vmem>>, vector<128x128xf32>
    tpu.vector_store %arg6[%c0_11, %c0_12], %25 {strides = array<i32>} : memref<128x128xf32, #tpu.memory_space<vmem>>, vector<128x128xf32>,
    return
  }
  func.func @transform_0(%arg0: i32, %arg1: i32) -> (i32, i32) {
    %c0_i32 = arith.constant 0 : i32
    %c0_i32_0 = arith.constant 0 : i32
    return %arg1, %c0_i32 : i32, i32
  }
  func.func @transform_1(%arg0: i32, %arg1: i32) -> (i32, i32) {
    %c0_i32 = arith.constant 0 : i32
    %c0_i32_0 = arith.constant 0 : i32
    return %arg1, %c0_i32 : i32, i32
  }
  func.func @transform_2(%arg0: i32, %arg1: i32) -> (i32, i32) {
    %c0_i32 = arith.constant 0 : i32
    %c0_i32_0 = arith.constant 0 : i32
    return %c0_i32, %arg1 : i32, i32
  }
  func.func @transform_3(%arg0: i32, %arg1: i32) -> (i32, i32) {
    %c0_i32 = arith.constant 0 : i32
    %c0_i32_0 = arith.constant 0 : i32
    return %c0_i32, %arg0 : i32, i32
  }
  func.func @transform_4(%arg0: i32, %arg1: i32) -> (i32, i32) {
    %c0_i32 = arith.constant 0 : i32
    %c0_i32_0 = arith.constant 0 : i32
    return %c0_i32, %arg0 : i32, i32
  }
}

</mosaic_0001>

<bundles_post_ra>
// kernel: tpu_custom_call.1
= control target key start
LH: loop header
LB: loop body
LE: loop exit
PB: predicated region body
PF: predicated region fallthrough
CT: control target
= control target key end

     0   :  { %9 = vsyncpa [#allocation3], 0  ;;  %s640_s0 = inlined_call_operand.vmem [shape: s32[16,1], index: 0, kind: input, shape index: {}]   ;;  %s641_s1 = inlined_call_operand.vmem [shape: s32[16,1], index: 1, kind: input, shape index: {}]   ;;  %s642_s2 = inlined_call_operand.vmem [shape: s32[1,16], index: 2, kind: input, shape index: {}]   ;;  %s643_s3 = inlined_call_operand.hbm [shape: f32[256,128], index: 3, kind: input, shape index: {}]   ;;  %s644_s4 = inlined_call_operand.hbm [shape: f32[128,128], index: 4, kind: output, shape index: {}]  }
   0x1   :  { %10 = vsyncpa [#allocation4], 0  ;;  %s21_s17 = sshll.u32 %s643_s3, 4  ;;  %s529_s18 = smov [#allocation2]   ;;  %s22_s17 = int_to_ptr.hbm [resolvable:$true] %s21_s17 }
   0x2   :  { %s23_s19 = sshll.u32 %s529_s18, 4  ;;  %s530_s20 = smov 128   ;;  %s24_s19 = int_to_ptr.vmem [resolvable:$true] %s23_s19 }
   0x3   :  { %s531_s21 = smov 8  }
   0x4   :  { %29 = dma.hbm_to_vmem [thread:$0]  %s22_s17, 4096, %s24_s19, [#allocation3], %s530_s20, %s530_s20, %s531_s21  }
   0x5   :  { %525 = dma.done.wait [#allocation3], 4096  }
   0x6   :  { %526 = vsyncadd [#allocation3], 4294963200  ;;  %v532_v0 = vmov 0   ;;  %v58_v1 = vld [vmem:[%s640_s0 + $0x8] sm:$0xff]  ;;  %v57_v2 = vld [vmem:[%s640_s0] sm:$0xff]  ;;  %v54_v39 = vlaneseq  ;;  %v533_v45 = vmov 1.0  }
   0x7   :  { %475 = vset.pattern.permute.xlu1 %v532_v0  ;;  %474 = vset.pattern.permute.xlu0 %v532_v0  ;;  %v70_v3 = vld [vmem:[%s641_s1 + $0x8] sm:$0xff]  ;;  %v110_v4 = vld [vmem:[#allocation2 + $0x78] sm:$0xff]  ;;  %v69_v6 = vld [vmem:[%s641_s1] sm:$0xff]  ;;  %v534_v57 = vmov 0.0   ;;  %vm256_vm14 = vcmask 130048   ;;  %s408_s6 = sshll.u32 %s644_s4, 4  ;;  %s409_s6 = int_to_ptr.hbm [resolvable:$true] %s408_s6 }
   0x8   :  { %63 = vperm.xlu1 %475, %v58_v1   ;;  %60 = vperm.xlu0 %474, %v57_v2   ;;  %v126_v5 = vld [vmem:[#allocation2 + $0xf8] sm:$0xff]  ;;  %v109_v7 = vld [vmem:[#allocation2 + $0x70] sm:$0xff]  ;;  %v108_v9 = vld [vmem:[#allocation2 + $0x68] sm:$0xff]  ;;  %v72_v11 = vadd.s32 128, %v70_v3  ;;  %v71_v12 = vadd.s32 128, %v69_v6  ;;  %v55_v41 = vand.u32 127, %v54_v39 }
   0x9   :  { %127 = vmatpush.msra.mxu0 %v110_v4  ;;  %150 = vmatpush.msra.mxu1 %v126_v5  ;;  %v125_v8 = vld [vmem:[#allocation2 + $0xf0] sm:$0xff]  ;;  %v124_v10 = vld [vmem:[#allocation2 + $0xe8] sm:$0xff]  ;;  %v107_v13 = vld [vmem:[#allocation2 + $0x60] sm:$0xff]  ;;  %v579_v49 = vshrl.u32 %v54_v39, 7 }
   0xa   :  { %v123_v14 = vld [vmem:[#allocation2 + $0xe0] sm:$0xff]  ;;  %v106_v15 = vld [vmem:[#allocation2 + $0x58] sm:$0xff]  ;;  %v105_v17 = vld [vmem:[#allocation2 + $0x50] sm:$0xff]  ;;  %v56_v43 = vadd.s32 128, %v55_v41 }
   0xb   :  { %128 = vmatpush.msra.mxu0 %v109_v7  ;;  %151 = vmatpush.msra.mxu1 %v125_v8  ;;  %v122_v16 = vld [vmem:[#allocation2 + $0xd8] sm:$0xff]  ;;  %v121_v18 = vld [vmem:[#allocation2 + $0xd0] sm:$0xff]  ;;  %v104_v19 = vld [vmem:[#allocation2 + $0x48] sm:$0xff]  ;;  %v176_v50 = vadd.s32 16, %v579_v49  ;;  %v183_v52 = vadd.s32 72, %v579_v49  ;;  %v177_v60 = vadd.s32 24, %v579_v49 }
   0xc   :  { %v120_v20 = vld [vmem:[#allocation2 + $0xc8] sm:$0xff]  ;;  %v103_v21 = vld [vmem:[#allocation2 + $0x40] sm:$0xff]  ;;  %v102_v23 = vld [vmem:[#allocation2 + $0x38] sm:$0xff]  ;;  %v184_v61 = vadd.s32 80, %v579_v49  ;;  %v178_v0 = vadd.s32 32, %v579_v49  ;;  %v185_v1 = vadd.s32 88, %v579_v49 }
   0xd   :  { %129 = vmatpush.msra.mxu0 %v108_v9  ;;  %152 = vmatpush.msra.mxu1 %v124_v10  ;;  %v119_v22 = vld [vmem:[#allocation2 + $0xc0] sm:$0xff]  ;;  %v118_v24 = vld [vmem:[#allocation2 + $0xb8] sm:$0xff]  ;;  %v101_v25 = vld [vmem:[#allocation2 + $0x30] sm:$0xff]  ;;  %v179_v4 = vadd.s32 40, %v579_v49  ;;  %v186_v5 = vadd.s32 96, %v579_v49  ;;  %v175_v6 = vadd.s32 8, %v579_v49 }
   0xe   :  { %v117_v26 = vld [vmem:[#allocation2 + $0xb0] sm:$0xff]  ;;  %v100_v27 = vld [vmem:[#allocation2 + $0x28] sm:$0xff]  ;;  %v99_v29 = vld [vmem:[#allocation2 + $0x20] sm:$0xff] }
   0xf   :  { %130 = vmatpush.msra.mxu0 %v107_v13  ;;  %153 = vmatpush.msra.mxu1 %v123_v14  ;;  %v116_v28 = vld [vmem:[#allocation2 + $0xa8] sm:$0xff]  ;;  %v115_v30 = vld [vmem:[#allocation2 + $0xa0] sm:$0xff]  ;;  %v98_v31 = vld [vmem:[#allocation2 + $0x18] sm:$0xff] }
  0x10   :  { %77 = vperm.xlu1 %475, %v72_v11   ;;  %74 = vperm.xlu0 %474, %v71_v12   ;;  %v114_v32 = vld [vmem:[#allocation2 + $0x98] sm:$0xff]  ;;  %v97_v33 = vld [vmem:[#allocation2 + $0x10] sm:$0xff]  ;;  %v96_v35 = vld [vmem:[#allocation2 + $0x8] sm:$0xff]  ;;  %v180_v11 = vadd.s32 48, %v579_v49  ;;  %v187_v12 = vadd.s32 104, %v579_v49 }
  0x11   :  { %131 = vmatpush.msra.mxu0 %v106_v15  ;;  %154 = vmatpush.msra.mxu1 %v122_v16  ;;  %v113_v34 = vld [vmem:[#allocation2 + $0x90] sm:$0xff]  ;;  %v112_v36 = vld [vmem:[#allocation2 + $0x88] sm:$0xff]  ;;  %v95_v37 = vld [vmem:[#allocation2] sm:$0xff]  ;;  %v181_v15 = vadd.s32 56, %v579_v49  ;;  %v188_v16 = vadd.s32 112, %v579_v49 }
  0x12   :  { %v111_v38 = vld [vmem:[#allocation2 + $0x80] sm:$0xff] }
  0x13   :  { %132 = vmatpush.msra.mxu0 %v105_v17  ;;  %155 = vmatpush.msra.mxu1 %v121_v18  ;;  %v585_v51 = vld [vmem:[%s642_s2] ss:$0 sm:$0xff]  ;;  %s535_s2 = smov [#allocation5]  }
  0x14   :  { %vm194_vm12 = vcmp.eq.s32.totalorder %v176_v50, %v585_v51  ;;  %vm201_vm13 = vcmp.eq.s32.totalorder %v183_v52, %v585_v51  ;;  %vm195_vm15 = vcmp.eq.s32.totalorder %v177_v60, %v585_v51  ;;  %s406_s29 = sshll.u32 %s535_s2, 4  ;;  %s407_s29 = int_to_ptr.vmem [resolvable:$true] %s406_s29 }
  0x15   :  { %133 = vmatpush.msra.mxu0 %v104_v19  ;;  %156 = vmatpush.msra.mxu1 %v120_v20  ;;  %v431_v58 = vsel %vm194_vm12, 1.0, %v534_v57  ;;  %v438_v59 = vsel %vm201_vm13, 1.0, %v534_v57  ;;  %v432_v62 = vsel %vm195_vm15, 1.0, %v534_v57  ;;  %v182_v19 = vadd.s32 64, %v579_v49 }
  0x16   :  { %v189_v20 = vadd.s32 120, %v579_v49 }
  0x17   :  { %134 = vmatpush.msra.mxu0 %v103_v21  ;;  %157 = vmatpush.msra.mxu1 %v119_v22 }
  0x18   :  { %vm207_vm12 = vcmp.eq.s32.totalorder %v189_v20, %v585_v51 }
  0x19   :  { %135 = vmatpush.msra.mxu0 %v102_v23  ;;  %158 = vmatpush.msra.mxu1 %v118_v24  ;;  %v444_v22 = vsel %vm207_vm12, 1.0, %v534_v57 }
  0x1b   :  { %136 = vmatpush.msra.mxu0 %v101_v25  ;;  %159 = vmatpush.msra.mxu1 %v117_v26 }
  0x1d   :  { %137 = vmatpush.msra.mxu0 %v100_v27  ;;  %160 = vmatpush.msra.mxu1 %v116_v28 }
  0x1f   :  { %138 = vmatpush.msra.mxu0 %v99_v29  ;;  %161 = vmatpush.msra.mxu1 %v115_v30 }
  0x21   :  { %139 = vmatpush.msra.mxu0 %v98_v31  ;;  %162 = vmatpush.msra.mxu1 %v114_v32 }
  0x23   :  { %140 = vmatpush.msra.mxu0 %v97_v33  ;;  %163 = vmatpush.msra.mxu1 %v113_v34 }
  0x25   :  { %141 = vmatpush.msra.mxu0 %v96_v35  ;;  %164 = vmatpush.msra.mxu1 %v112_v36 }
  0x27   :  { %142 = vmatpush.msra.mxu0 %v95_v37  ;;  %165 = vmatpush.msra.mxu1 %v111_v38 }
  0x7a   :  { %v61_v40 = vpop.permute.xlu0 %60  ;;  %v64_v42 = vpop.permute.xlu1 %63 }
  0x7b   :  { %vm65_vm2 = vcmp.eq.s32.totalorder %v55_v41, %v61_v40  ;;  %vm66_vm3 = vcmp.eq.s32.totalorder %v56_v43, %v61_v40  ;;  %vm67_vm6 = vcmp.eq.s32.totalorder %v55_v41, %v64_v42  ;;  %vm68_vm8 = vcmp.eq.s32.totalorder %v56_v43, %v64_v42 }
  0x82   :  { %v75_v44 = vpop.permute.xlu0 %74  ;;  %v78_v46 = vpop.permute.xlu1 %77 }
  0x83   :  { %vm79_vm0 = vcmp.eq.s32.totalorder %v55_v41, %v75_v44  ;;  %vm80_vm1 = vcmp.eq.s32.totalorder %v56_v43, %v75_v44  ;;  %vm81_vm7 = vcmp.eq.s32.totalorder %v55_v41, %v78_v46  ;;  %vm82_vm9 = vcmp.eq.s32.totalorder %v56_v43, %v78_v46 }
  0x84   :  { %vm83_vm4 = vmor %vm65_vm2, %vm79_vm0  ;;  %vm202_vm0 = vcmp.eq.s32.totalorder %v184_v61, %v585_v51  ;;  %vm203_vm2 = vcmp.eq.s32.totalorder %v185_v1, %v585_v51 }
  0x85   :  { %vm84_vm5 = vmor %vm66_vm3, %vm80_vm1  ;;  %425 = vmatmul.msk.f32.vlgmr.msra.gmra.mxu0 %vm83_vm4, %v533_v45  ;;  %v439_v63 = vsel %vm202_vm0, 1.0, %v534_v57  ;;  %vm196_vm1 = vcmp.eq.s32.totalorder %v178_v0, %v585_v51  ;;  %v440_v3 = vsel %vm203_vm2, 1.0, %v534_v57  ;;  %vm192_vm3 = vcmp.eq.s32.totalorder %v579_v49, %v585_v51 }
  0x86   :  { %427 = vmatmul.msk.f32.vlgmr.msra.gmra.mxu1 %vm84_vm5, %v533_v45  ;;  %vm85_vm10 = vmor %vm67_vm6, %vm81_vm7  ;;  %v433_v2 = vsel %vm196_vm1, 1.0, %v534_v57  ;;  %v429_v7 = vsel %vm192_vm3, 1.0, %v534_v57  ;;  %vm197_vm4 = vcmp.eq.s32.totalorder %v179_v4, %v585_v51  ;;  %vm204_vm5 = vcmp.eq.s32.totalorder %v186_v5, %v585_v51 }
  0x87   :  { %vm86_vm11 = vmor %vm68_vm8, %vm82_vm9  ;;  %vm193_vm6 = vcmp.eq.s32.totalorder %v175_v6, %v585_v51  ;;  %v434_v9 = vsel %vm197_vm4, 1.0, %v534_v57  ;;  %v441_v10 = vsel %vm204_vm5, 1.0, %v534_v57  ;;  %vm198_vm7 = vcmp.eq.s32.totalorder %v180_v11, %v585_v51 }
  0x88   :  { %v430_v8 = vsel %vm193_vm6, 1.0, %v534_v57  ;;  %vm205_vm8 = vcmp.eq.s32.totalorder %v187_v12, %v585_v51  ;;  %v435_v13 = vsel %vm198_vm7, 1.0, %v534_v57  ;;  %vm199_vm9 = vcmp.eq.s32.totalorder %v181_v15, %v585_v51 }
  0x89   :  { %v442_v14 = vsel %vm205_vm8, 1.0, %v534_v57  ;;  %v436_v17 = vsel %vm199_vm9, 1.0, %v534_v57 }
  0x8d   :  { %426 = vmatmul.msk.f32.gmra.mxu0 %vm85_vm10, %v533_v45  ;;  %vm206_vm10 = vcmp.eq.s32.totalorder %v188_v16, %v585_v51 }
  0x8e   :  { %428 = vmatmul.msk.f32.gmra.mxu1 %vm86_vm11, %v533_v45  ;;  %v443_v18 = vsel %vm206_vm10, 1.0, %v534_v57  ;;  %vm200_vm11 = vcmp.eq.s32.totalorder %v182_v19, %v585_v51 }
  0x8f   :  { %v437_v21 = vsel %vm200_vm11, 1.0, %v534_v57 }
 0x102   :  { %v144_v47 = vpop.f32.mrf.mxu0 }
 0x103   :  { %v167_v48 = vpop.f32.mrf.mxu1 }
 0x104   :  { %v168_v56 = vadd.f32 %v167_v48, %v144_v47 }
 0x10a   :  { %v147_v53 = vpop.f32.mrf.mxu0 }
 0x10b   :  { %v170_v54 = vpop.f32.mrf.mxu1 }
 0x10c   :  { %v171_v55 = vadd.f32 %v170_v54, %v147_v53 }
 0x10e   :  { %319 = vmatpush.msrb.mxu0 %v171_v55  ;;  %461 = vmatpush.msrb.mxu1 %v171_v55 }
 0x10f   :  { %462 = vmatpush.msra.mxu2 %v171_v55  ;;  %463 = vmatpush.msra.mxu3 %v171_v55 }
 0x110   :  { %320 = vmatpush.msrb.mxu0 %v168_v56  ;;  %464 = vmatpush.msrb.mxu1 %v168_v56 }
 0x111   :  { %465 = vmatpush.msra.mxu2 %v168_v56  ;;  %466 = vmatpush.msra.mxu3 %v168_v56 }
 0x112   :  { %447 = vmatmul.msk.f32.vlgmr.msra.gmra.mxu2 %vm256_vm14, %v431_v58  ;;  %454 = vmatmul.msk.f32.vlgmr.msra.gmra.mxu3 %vm256_vm14, %v438_v59 }
 0x113   :  { %445 = vmatmul.msk.f32.vlgmr.msrb.gmra.mxu0 %vm256_vm14, %v429_v7  ;;  %446 = vmatmul.msk.f32.vlgmr.msrb.gmra.mxu1 %vm256_vm14, %v430_v8 }
 0x11a   :  { %448 = vmatmul.msk.f32.gmra.mxu2 %vm256_vm14, %v432_v62  ;;  %455 = vmatmul.msk.f32.gmra.mxu3 %vm256_vm14, %v439_v63 }
 0x122   :  { %449 = vmatmul.msk.f32.gmra.mxu2 %vm256_vm14, %v433_v2  ;;  %456 = vmatmul.msk.f32.gmra.mxu3 %vm256_vm14, %v440_v3 }
 0x12a   :  { %450 = vmatmul.msk.f32.gmra.mxu2 %vm256_vm14, %v434_v9  ;;  %457 = vmatmul.msk.f32.gmra.mxu3 %vm256_vm14, %v441_v10 }
 0x132   :  { %451 = vmatmul.msk.f32.gmra.mxu2 %vm256_vm14, %v435_v13  ;;  %458 = vmatmul.msk.f32.gmra.mxu3 %vm256_vm14, %v442_v14 }
 0x13a   :  { %452 = vmatmul.msk.f32.gmra.mxu2 %vm256_vm14, %v436_v17  ;;  %459 = vmatmul.msk.f32.gmra.mxu3 %vm256_vm14, %v443_v18 }
 0x142   :  { %453 = vmatmul.msk.f32.gmra.mxu2 %vm256_vm14, %v437_v21  ;;  %460 = vmatmul.msk.f32.gmra.mxu3 %vm256_vm14, %v444_v22 }
 0x190   :  { %v322_v27 = vpop.f32.mrf.mxu0  ;;  %v325_v28 = vpop.f32.mrf.mxu1 }
 0x191   :  { %386 = vst [vmem:[#allocation5] sm:$0xff] %v322_v27 }
 0x192   :  { %387 = vst [vmem:[#allocation5 + $0x8] sm:$0xff] %v325_v28 }
 0x195   :  { %v328_v23 = vpop.f32.mrf.mxu2  ;;  %v349_v24 = vpop.f32.mrf.mxu3 }
 0x196   :  { %388 = vst [vmem:[#allocation5 + $0x10] sm:$0xff] %v328_v23 }
 0x197   :  { %395 = vst [vmem:[#allocation5 + $0x48] sm:$0xff] %v349_v24 }
 0x19d   :  { %v331_v25 = vpop.f32.mrf.mxu2  ;;  %v352_v26 = vpop.f32.mrf.mxu3 }
 0x19e   :  { %389 = vst [vmem:[#allocation5 + $0x18] sm:$0xff] %v331_v25 }
 0x19f   :  { %396 = vst [vmem:[#allocation5 + $0x50] sm:$0xff] %v352_v26 }
 0x1a5   :  { %v334_v29 = vpop.f32.mrf.mxu2  ;;  %v355_v30 = vpop.f32.mrf.mxu3 }
 0x1a6   :  { %390 = vst [vmem:[#allocation5 + $0x20] sm:$0xff] %v334_v29 }
 0x1a7   :  { %397 = vst [vmem:[#allocation5 + $0x58] sm:$0xff] %v355_v30 }
 0x1ad   :  { %v337_v31 = vpop.f32.mrf.mxu2  ;;  %v358_v32 = vpop.f32.mrf.mxu3 }
 0x1ae   :  { %391 = vst [vmem:[#allocation5 + $0x28] sm:$0xff] %v337_v31 }
 0x1af   :  { %398 = vst [vmem:[#allocation5 + $0x60] sm:$0xff] %v358_v32 }
 0x1b5   :  { %v340_v33 = vpop.f32.mrf.mxu2  ;;  %v361_v34 = vpop.f32.mrf.mxu3 }
 0x1b6   :  { %392 = vst [vmem:[#allocation5 + $0x30] sm:$0xff] %v340_v33 }
 0x1b7   :  { %399 = vst [vmem:[#allocation5 + $0x68] sm:$0xff] %v361_v34 }
 0x1bd   :  { %v343_v35 = vpop.f32.mrf.mxu2  ;;  %v364_v36 = vpop.f32.mrf.mxu3 }
 0x1be   :  { %393 = vst [vmem:[#allocation5 + $0x38] sm:$0xff] %v343_v35 }
 0x1bf   :  { %400 = vst [vmem:[#allocation5 + $0x70] sm:$0xff] %v364_v36 }
 0x1c5   :  { %v346_v37 = vpop.f32.mrf.mxu2  ;;  %v367_v38 = vpop.f32.mrf.mxu3 }
 0x1c6   :  { %394 = vst [vmem:[#allocation5 + $0x40] sm:$0xff] %v346_v37 }
 0x1c7   :  { %401 = vst [vmem:[#allocation5 + $0x78] sm:$0xff] %v367_v38 }
 0x1c8   :  { %414 = dma.vmem_to_hbm [thread:$0]  %s407_s29, 2048, %s409_s6, [#allocation4], %s530_s20, %s530_s20, %s531_s21  }
 0x1c9   :  { %527 = dma.done.wait [#allocation4], 2048  }
 0x1ca   :  { %528 = vsyncadd [#allocation4], 4294965248 }
 0x1cb   :  { %419 = vsyncpa [#allocation3], 1 }
 0x1cc   :  { %420 = vsyncpa [#allocation4], 1 }

</bundles_post_ra>
